<compile_context>
chip_gen: v5e
topology: v5e:2x2
jax: 0.10.0
libtpu: 0.0.40
codegen_flags: <defaults>
</compile_context>

<pallas_src>
import functools

import jax
import jax.numpy as jnp
from jax.experimental import pallas as pl
from jax.experimental.pallas import tpu as pltpu

LANE = 128   # vreg lane width (last dim)


def _round_up(x: int, m: int) -> int:
    return ((x + m - 1) // m) * m


def _choose_tm(batch: int, tm: int, sublane: int) -> int:
    """Batch tile: <= tm, multiple of the dtype's sublane packing, and (when the
    batch allows it) small enough that the parallel grid has >= 2 tiles so both
    v7x TensorCores get work."""
    tm_eff = min(_round_up(tm, sublane), _round_up(batch, sublane))
    if batch >= 2 * sublane:
        tm_eff = min(tm_eff, _round_up(pl.cdiv(batch, 2), sublane))
    return max(tm_eff, sublane)


def two_layer_kernel(x_ref, w1_ref, b1_ref, w2_ref, b2_ref, o_ref):
    """One batch tile: relu(relu(x @ W1 + b1) @ W2 + b2). Everything in VMEM."""
    x = x_ref[...].astype(w1_ref.dtype)                               # cast for MXU (no-op on f32 path)
    h = jnp.dot(x, w1_ref[...], preferred_element_type=jnp.float32)   # MXU, f32 acc
    h = jnp.maximum(h + b1_ref[...], 0.0)                             # f32 epilogue (VPU)
    h = h.astype(w2_ref.dtype)                                        # bf16 path: halves h vreg pressure
    y = jnp.dot(h, w2_ref[...], preferred_element_type=jnp.float32)   # MXU, f32 acc
    o_ref[...] = jnp.maximum(y + b2_ref[...], 0.0).astype(o_ref.dtype)


def pad_params(w1, b1, w2, b2, compute_dtype=jnp.bfloat16):
    """Pad/cast parameters ONCE (cache the result; do not call per forward).

    w1:(c_in,c_hidden) b1:(c_hidden,) w2:(c_hidden,c_out) b2:(c_out,).
    c_hidden / c_out are zero-padded to multiples of 128 (exact math: padded
    rows/cols/bias lanes are zero).  c_in is left untouched -- the kernel uses
    full-K blocks, so no K padding in HBM is needed."""
    c_in, c_hidden = w1.shape
    c_out = w2.shape[1]
    hp = _round_up(c_hidden, LANE)
    np_ = _round_up(c_out, LANE)
    cd = compute_dtype
    w1p = jnp.zeros((c_in, hp), cd).at[:, :c_hidden].set(w1.astype(cd))
    w2p = jnp.zeros((hp, np_), cd).at[:c_hidden, :c_out].set(w2.astype(cd))
    b1p = jnp.zeros((1, hp), jnp.float32).at[0, :c_hidden].set(b1.astype(jnp.float32))
    b2p = jnp.zeros((1, np_), jnp.float32).at[0, :c_out].set(b2.astype(jnp.float32))
    return w1p, b1p, w2p, b2p


@functools.partial(jax.jit, static_argnames=("c_out", "tm"))
def two_layer_forward(x_nchw, w1p, b1p, w2p, b2p, *, c_out, tm=None):
    """x_nchw: (B, C, H, W). Params must come from pad_params (padded & cast once).
    Returns (B, c_out) float32."""
    B = x_nchw.shape[0]
    x2d = x_nchw.reshape(B, -1)              # nn.Flatten (row-major), pure glue
    c_in = x2d.shape[1]
    assert w1p.shape[0] == c_in
    hp = w1p.shape[1]
    np_ = w2p.shape[1]

    x_isz = jnp.dtype(x2d.dtype).itemsize
    w_isz = jnp.dtype(w1p.dtype).itemsize
    # dtype-aware sublane packing for the streamed x tile (8 rows f32, 16 bf16).
    sublane = max(8, 32 // x_isz)
    if tm is None:
        tm = 256 if w_isz >= 4 else 512      # f32 keeps h at <= half the vreg file
    TM = _choose_tm(B, tm, sublane)
    ntiles = pl.cdiv(B, TM)
    b_pad = ntiles * TM                      # output only; x itself is NOT padded

    # --- cost estimate (copy-free wrapper) ---
    flops = 2 * B * (c_in * hp + hp * np_)
    bytes_accessed = (B * c_in * x_isz                      # stream x once
                      + (c_in * hp + hp * np_) * w_isz      # resident weights
                      + (hp + np_) * 4                      # biases
                      + b_pad * np_ * 4)                    # output writeback
    cost = pl.CostEstimate(flops=flops, transcendentals=0,
                           bytes_accessed=bytes_accessed)

    # --- VMEM budget re-derived from the actual (lane-padded) tiles ---
    k_vmem = _round_up(c_in, LANE)           # x block lane-pads to this in VMEM
    vmem_need = (2 * TM * k_vmem * x_isz              # double-buffered x tile
                 + 2 * TM * np_ * 4                   # double-buffered out tile
                 + 2 * (k_vmem * hp + hp * np_) * w_isz   # weights (2x pipeline bufs)
                 + 2 * 8 * (hp + np_) * 4             # biases (sublane-padded)
                 + TM * k_vmem * w_isz                # in-kernel cast copy of x
                 + 2 * TM * hp * 4)                   # hidden activation + slack
    # need + generous margin; comfortably below v7x's 64 MiB physical VMEM.
    vmem_limit = int(min(vmem_need * 2 + (8 << 20), 48 << 20))

    out_padded = pl.pallas_call(
        two_layer_kernel,
        out_shape=jax.ShapeDtypeStruct((b_pad, np_), jnp.float32),
        grid_spec=pltpu.PrefetchScalarGridSpec(
            num_scalar_prefetch=0,
            grid=(ntiles,),
            in_specs=[
                # x: streamed over batch; full-K block (K == full array dim, so
                # the (8,128)-or-full rule is satisfied; Mosaic lane-pads in VMEM).
                pl.BlockSpec((TM, c_in), lambda i: (i, 0)),
                pl.BlockSpec((c_in, hp), lambda i: (0, 0)),   # W1: resident
                pl.BlockSpec((1, hp), lambda i: (0, 0)),      # b1: resident
                pl.BlockSpec((hp, np_), lambda i: (0, 0)),    # W2: resident
                pl.BlockSpec((1, np_), lambda i: (0, 0)),     # b2: resident
            ],
            out_specs=pl.BlockSpec((TM, np_), lambda i: (i, 0)),
        ),
        compiler_params=pltpu.CompilerParams(
            dimension_semantics=("parallel",),   # batch tiles shard across v7x TCs
            vmem_limit_bytes=vmem_limit,
        ),
        cost_estimate=cost,
    )(x2d, w1p, b1p, w2p, b2p)

    # Slice off batch padding and lane padding (pure glue).
    return out_padded[:B, :c_out]


def init_params(key, c_in, c_hidden, c_out):
    """Deterministic init mimicking nn.Linear default (uniform +/- 1/sqrt(fan_in)).
    Weights stored as (in, out) == transpose of PyTorch's (out, in)."""
    k1, k2, k3, k4 = jax.random.split(key, 4)
    bound1 = 1.0 / jnp.sqrt(jnp.float32(c_in))
    bound2 = 1.0 / jnp.sqrt(jnp.float32(c_hidden))
    w1 = jax.random.uniform(k1, (c_in, c_hidden), jnp.float32, -bound1, bound1)
    b1 = jax.random.uniform(k2, (c_hidden,), jnp.float32, -bound1, bound1)
    w2 = jax.random.uniform(k3, (c_hidden, c_out), jnp.float32, -bound2, bound2)
    b2 = jax.random.uniform(k4, (c_out,), jnp.float32, -bound2, bound2)
    return w1, b1, w2, b2


def reference(x, w1, b1, w2, b2):
    x2d = x.reshape(x.shape[0], -1)
    h = jnp.maximum(x2d @ w1 + b1[None, :], 0.0)
    return jnp.maximum(h @ w2 + b2[None, :], 0.0)


if __name__ == "__main__":
    # TwoLayer('relu', c_in=28*28, c_hidden=50, c_out=10), MNIST-like images.
    B, C, H, W = 4, 1, 28, 28
    c_in, c_hidden, c_out = C * H * W, 50, 10

    key = jax.random.PRNGKey(0)
    kx, kp = jax.random.split(key)
    x = jax.random.normal(kx, (B, C, H, W), jnp.float32)
    w1, b1, w2, b2 = init_params(kp, c_in, c_hidden, c_out)
    ref = reference(x, w1, b1, w2, b2)

    # f32 path (exact vs reference). Params padded ONCE.
    pf32 = pad_params(w1, b1, w2, b2, compute_dtype=jnp.float32)
    out = jax.block_until_ready(two_layer_forward(x, *pf32, c_out=c_out))
    assert out.shape == (B, c_out)
    assert jnp.allclose(out, ref, atol=1e-5, rtol=1e-5)

    # bf16 MXU path (recommended default on v6e/v7x); f32 accumulation keeps the
    # error small, so only a modestly looser tolerance is needed.
    pbf16 = pad_params(w1, b1, w2, b2)  # bf16 default
    out_bf16 = jax.block_until_ready(two_layer_forward(x, *pbf16, c_out=c_out))
    assert out_bf16.shape == (B, c_out)
    assert jnp.allclose(out_bf16, ref, atol=5e-2, rtol=5e-2)

    # Larger batch: exercises the multi-tile "parallel" grid (>=2 tiles => both
    # v7x TensorCores fed) and the partial last x block (B not multiple of TM).
    B2 = 68
    x2 = jax.random.normal(kx, (B2, C, H, W), jnp.float32)
    ref2 = reference(x2, w1, b1, w2, b2)
    out2 = jax.block_until_ready(two_layer_forward(x2, *pf32, c_out=c_out))
    assert out2.shape == (B2, c_out)
    assert jnp.allclose(out2, ref2, atol=1e-5, rtol=1e-5)

    print("KERNEL_OK")
</pallas_src>

<mosaic_0001>
module attributes {stable_mosaic.version = 11 : i64} {
  func.func @two_layer_kernel(%arg0: i32, %arg1: memref<8x784xf32, #tpu.memory_space<vmem>>, %arg2: memref<784x128xf32, #tpu.memory_space<vmem>>, %arg3: memref<1x128xf32, #tpu.memory_space<vmem>>, %arg4: memref<128x128xf32, #tpu.memory_space<vmem>>, %arg5: memref<1x128xf32, #tpu.memory_space<vmem>>, %arg6: memref<8x128xf32, #tpu.memory_space<vmem>>) attributes {dimension_semantics = [#tpu.dimension_semantics<parallel>], iteration_bounds = array<i64: 1>, scalar_prefetch = 0 : i64, scratch_operands = 0 : i64, tpu.core_type = #tpu.core_type<tc>, window_params = [{transform_indices = @transform_0, window_bounds = array<i64: 8, 784>}, {pipeline_mode = #tpu.pipeline_mode<synchronous>, transform_indices = @transform_1, window_bounds = array<i64: 784, 128>}, {pipeline_mode = #tpu.pipeline_mode<synchronous>, transform_indices = @transform_2, window_bounds = array<i64: 1, 128>}, {pipeline_mode = #tpu.pipeline_mode<synchronous>, transform_indices = @transform_3, window_bounds = array<i64: 128, 128>}, {pipeline_mode = #tpu.pipeline_mode<synchronous>, transform_indices = @transform_4, window_bounds = array<i64: 1, 128>}, {transform_indices = @transform_5, window_bounds = array<i64: 8, 128>}]} {
    %c0 = arith.constant 0 : index
    %c0_0 = arith.constant 0 : index
    %0 = vector.load %arg1[%c0, %c0_0] : memref<8x784xf32, #tpu.memory_space<vmem>>, vector<8x784xf32>
    %c0_1 = arith.constant 0 : index
    %c0_2 = arith.constant 0 : index
    %1 = vector.load %arg2[%c0_1, %c0_2] : memref<784x128xf32, #tpu.memory_space<vmem>>, vector<784x128xf32>
    %cst = arith.constant dense<0.000000e+00> : vector<8x128xf32>
    %2 = tpu.matmul %0, %1, %cst {dimension_numbers = #tpu.dot_dimension_numbers<[1], [0], [0], [1], [0, 0, 1, 1], [], []>} : vector<8x784xf32>, vector<784x128xf32>, vector<8x128xf32> -> vector<8x128xf32>
    %c0_3 = arith.constant 0 : index
    %c0_4 = arith.constant 0 : index
    %3 = vector.load %arg3[%c0_3, %c0_4] : memref<1x128xf32, #tpu.memory_space<vmem>>, vector<1x128xf32>
    %4 = vector.broadcast %3 : vector<1x128xf32> to vector<8x128xf32>
    %5 = arith.addf %2, %4 : vector<8x128xf32>
    %cst_5 = arith.constant 0.000000e+00 : f32
    %6 = vector.broadcast %cst_5 : f32 to vector<8x128xf32>
    %7 = arith.maximumf %5, %6 : vector<8x128xf32>
    %c0_6 = arith.constant 0 : index
    %c0_7 = arith.constant 0 : index
    %8 = vector.load %arg4[%c0_6, %c0_7] : memref<128x128xf32, #tpu.memory_space<vmem>>, vector<128x128xf32>
    %cst_8 = arith.constant dense<0.000000e+00> : vector<8x128xf32>
    %9 = tpu.matmul %7, %8, %cst_8 {dimension_numbers = #tpu.dot_dimension_numbers<[1], [0], [0], [1], [0, 0, 1, 1], [], []>} : vector<8x128xf32>, vector<128x128xf32>, vector<8x128xf32> -> vector<8x128xf32>
    %c0_9 = arith.constant 0 : index
    %c0_10 = arith.constant 0 : index
    %10 = vector.load %arg5[%c0_9, %c0_10] : memref<1x128xf32, #tpu.memory_space<vmem>>, vector<1x128xf32>
    %11 = vector.broadcast %10 : vector<1x128xf32> to vector<8x128xf32>
    %12 = arith.addf %9, %11 : vector<8x128xf32>
    %cst_11 = arith.constant 0.000000e+00 : f32
    %13 = vector.broadcast %cst_11 : f32 to vector<8x128xf32>
    %14 = arith.maximumf %12, %13 : vector<8x128xf32>
    %c0_12 = arith.constant 0 : index
    %c0_13 = arith.constant 0 : index
    %15 = vector.load %arg6[%c0_12, %c0_13] : memref<8x128xf32, #tpu.memory_space<vmem>>, vector<8x128xf32>
    tpu.vector_store %arg6[%c0_12, %c0_13], %14 {strides = array<i32>} : memref<8x128xf32, #tpu.memory_space<vmem>>, vector<8x128xf32>,
    return
  }
  func.func @transform_0(%arg0: i32) -> (i32, i32) {
    %c0_i32 = arith.constant 0 : i32
    %c0_i32_0 = arith.constant 0 : i32
    return %arg0, %c0_i32 : i32, i32
  }
  func.func @transform_1(%arg0: i32) -> (i32, i32) {
    %c0_i32 = arith.constant 0 : i32
    %c0_i32_0 = arith.constant 0 : i32
    %c0_i32_1 = arith.constant 0 : i32
    return %c0_i32, %c0_i32_0 : i32, i32
  }
  func.func @transform_2(%arg0: i32) -> (i32, i32) {
    %c0_i32 = arith.constant 0 : i32
    %c0_i32_0 = arith.constant 0 : i32
    %c0_i32_1 = arith.constant 0 : i32
    return %c0_i32, %c0_i32_0 : i32, i32
  }
  func.func @transform_3(%arg0: i32) -> (i32, i32) {
    %c0_i32 = arith.constant 0 : i32
    %c0_i32_0 = arith.constant 0 : i32
    %c0_i32_1 = arith.constant 0 : i32
    return %c0_i32, %c0_i32_0 : i32, i32
  }
  func.func @transform_4(%arg0: i32) -> (i32, i32) {
    %c0_i32 = arith.constant 0 : i32
    %c0_i32_0 = arith.constant 0 : i32
    %c0_i32_1 = arith.constant 0 : i32
    return %c0_i32, %c0_i32_0 : i32, i32
  }
  func.func @transform_5(%arg0: i32) -> (i32, i32) {
    %c0_i32 = arith.constant 0 : i32
    %c0_i32_0 = arith.constant 0 : i32
    return %arg0, %c0_i32 : i32, i32
  }
}

</mosaic_0001>

<bundles_post_ra>
// kernel: two_layer_forward.1
= control target key start
LH: loop header
LB: loop body
LE: loop exit
PB: predicated region body
PF: predicated region fallthrough
CT: control target
= control target key end

     0   :  { %10 = vsyncpa [#allocation3], 0  ;;  %s405_s21 = smov [#allocation2]   ;;  %s406_s23 = smov 128   ;;  %s522_s0 = inlined_call_operand.vmem [shape: f32[4,784], index: 0, kind: input, shape index: {}]   ;;  %s523_s1 = inlined_call_operand.hbm [shape: f32[784,128], index: 1, kind: input, shape index: {}]   ;;  %s524_s2 = inlined_call_operand.vmem [shape: f32[1,128], index: 2, kind: input, shape index: {}]   ;;  %s525_s3 = inlined_call_operand.vmem [shape: f32[128,128], index: 3, kind: input, shape index: {}]   ;;  %s526_s4 = inlined_call_operand.vmem [shape: f32[1,128], index: 4, kind: input, shape index: {}]   ;;  %s527_s5 = inlined_call_operand.vmem [shape: f32[8,128], index: 5, kind: output, shape index: {}]  }
   0x1   :  { %s17_s20 = sshll.u32 %s523_s1, 4  ;;  %s19_s22 = sshll.u32 %s405_s21, 4  ;;  %s18_s20 = int_to_ptr.hbm [resolvable:$true] %s17_s20  ;;  %s20_s22 = int_to_ptr.vmem [resolvable:$true] %s19_s22 }
   0x2   :  { %s407_s24 = smov 8  }
   0x3   :  { %25 = dma.hbm_to_vmem [thread:$0]  %s18_s20, 12544, %s20_s22, [#allocation3], %s406_s23, %s406_s23, %s407_s24  }
   0x4   :  { %403 = dma.done.wait [#allocation3], 12544  }
   0x5   :  { %404 = vsyncadd [#allocation3], 4294954752  ;;  %v59_v0 = vld [vmem:[#allocation2 + $0x78] sm:$0xff]  ;;  %v58_v1 = vld [vmem:[#allocation2 + $0x70] sm:$0xff]  ;;  %vm182_vm0 = vcmask 130048  }
   0x6   :  { %v75_v2 = vld [vmem:[#allocation2 + $0xf8] sm:$0xff]  ;;  %185 = vmatpush.msra.mxu0 %v59_v0  ;;  %v74_v3 = vld [vmem:[#allocation2 + $0xf0] sm:$0xff]  ;;  %v57_v4 = vld [vmem:[#allocation2 + $0x68] sm:$0xff] }
   0x7   :  { %205 = vmatpush.msra.mxu1 %v75_v2  ;;  %v73_v5 = vld [vmem:[#allocation2 + $0xe8] sm:$0xff]  ;;  %v56_v6 = vld [vmem:[#allocation2 + $0x60] sm:$0xff]  ;;  %v55_v8 = vld [vmem:[#allocation2 + $0x58] sm:$0xff] }
   0x8   :  { %186 = vmatpush.msra.mxu0 %v58_v1  ;;  %v72_v7 = vld [vmem:[#allocation2 + $0xe0] sm:$0xff]  ;;  %v71_v9 = vld [vmem:[#allocation2 + $0xd8] sm:$0xff]  ;;  %v54_v10 = vld [vmem:[#allocation2 + $0x50] sm:$0xff] }
   0x9   :  { %206 = vmatpush.msra.mxu1 %v74_v3  ;;  %v91_v11 = vld [vmem:[#allocation2 + $0x178] sm:$0xff]  ;;  %v70_v12 = vld [vmem:[#allocation2 + $0xd0] sm:$0xff]  ;;  %v89_v15 = vld [vmem:[#allocation2 + $0x168] sm:$0xff] }
   0xa   :  { %187 = vmatpush.msra.mxu0 %v57_v4  ;;  %225 = vmatpush.msra.mxu2 %v91_v11  ;;  %v90_v13 = vld [vmem:[#allocation2 + $0x170] sm:$0xff]  ;;  %v107_v14 = vld [vmem:[#allocation2 + $0x1f8] sm:$0xff]  ;;  %v53_v17 = vld [vmem:[#allocation2 + $0x48] sm:$0xff] }
   0xb   :  { %207 = vmatpush.msra.mxu1 %v73_v5  ;;  %v106_v16 = vld [vmem:[#allocation2 + $0x1f0] sm:$0xff]  ;;  %v69_v18 = vld [vmem:[#allocation2 + $0xc8] sm:$0xff]  ;;  %245 = vmatpush.msra.mxu3 %v107_v14  ;;  %v88_v19 = vld [vmem:[#allocation2 + $0x160] sm:$0xff] }
   0xc   :  { %188 = vmatpush.msra.mxu0 %v56_v6  ;;  %226 = vmatpush.msra.mxu2 %v90_v13  ;;  %v105_v20 = vld [vmem:[#allocation2 + $0x1e8] sm:$0xff]  ;;  %v52_v21 = vld [vmem:[#allocation2 + $0x40] sm:$0xff]  ;;  %v87_v23 = vld [vmem:[#allocation2 + $0x158] sm:$0xff] }
   0xd   :  { %208 = vmatpush.msra.mxu1 %v72_v7  ;;  %v68_v22 = vld [vmem:[#allocation2 + $0xc0] sm:$0xff]  ;;  %246 = vmatpush.msra.mxu3 %v106_v16  ;;  %v51_v25 = vld [vmem:[#allocation2 + $0x38] sm:$0xff]  ;;  %v86_v27 = vld [vmem:[#allocation2 + $0x150] sm:$0xff] }
   0xe   :  { %189 = vmatpush.msra.mxu0 %v55_v8  ;;  %227 = vmatpush.msra.mxu2 %v89_v15  ;;  %v104_v24 = vld [vmem:[#allocation2 + $0x1e0] sm:$0xff]  ;;  %v67_v26 = vld [vmem:[#allocation2 + $0xb8] sm:$0xff]  ;;  %v50_v29 = vld [vmem:[#allocation2 + $0x30] sm:$0xff] }
   0xf   :  { %209 = vmatpush.msra.mxu1 %v71_v9  ;;  %247 = vmatpush.msra.mxu3 %v105_v20  ;;  %v103_v28 = vld [vmem:[#allocation2 + $0x1d8] sm:$0xff]  ;;  %v66_v30 = vld [vmem:[#allocation2 + $0xb0] sm:$0xff]  ;;  %v85_v31 = vld [vmem:[#allocation2 + $0x148] sm:$0xff] }
  0x10   :  { %190 = vmatpush.msra.mxu0 %v54_v10  ;;  %228 = vmatpush.msra.mxu2 %v88_v19  ;;  %v102_v32 = vld [vmem:[#allocation2 + $0x1d0] sm:$0xff]  ;;  %v49_v33 = vld [vmem:[#allocation2 + $0x28] sm:$0xff]  ;;  %v84_v35 = vld [vmem:[#allocation2 + $0x140] sm:$0xff] }
  0x11   :  { %210 = vmatpush.msra.mxu1 %v70_v12  ;;  %248 = vmatpush.msra.mxu3 %v104_v24  ;;  %v65_v34 = vld [vmem:[#allocation2 + $0xa8] sm:$0xff]  ;;  %v48_v37 = vld [vmem:[#allocation2 + $0x20] sm:$0xff]  ;;  %v83_v39 = vld [vmem:[#allocation2 + $0x138] sm:$0xff] }
  0x12   :  { %191 = vmatpush.msra.mxu0 %v53_v17  ;;  %229 = vmatpush.msra.mxu2 %v87_v23  ;;  %v101_v36 = vld [vmem:[#allocation2 + $0x1c8] sm:$0xff]  ;;  %v64_v38 = vld [vmem:[#allocation2 + $0xa0] sm:$0xff]  ;;  %v47_v41 = vld [vmem:[#allocation2 + $0x18] sm:$0xff] }
  0x13   :  { %211 = vmatpush.msra.mxu1 %v69_v18  ;;  %249 = vmatpush.msra.mxu3 %v103_v28  ;;  %v100_v40 = vld [vmem:[#allocation2 + $0x1c0] sm:$0xff]  ;;  %v63_v42 = vld [vmem:[#allocation2 + $0x98] sm:$0xff]  ;;  %v82_v43 = vld [vmem:[#allocation2 + $0x130] sm:$0xff] }
  0x14   :  { %192 = vmatpush.msra.mxu0 %v52_v21  ;;  %230 = vmatpush.msra.mxu2 %v86_v27  ;;  %v99_v44 = vld [vmem:[#allocation2 + $0x1b8] sm:$0xff]  ;;  %v46_v45 = vld [vmem:[#allocation2 + $0x10] sm:$0xff]  ;;  %v81_v47 = vld [vmem:[#allocation2 + $0x128] sm:$0xff] }
  0x15   :  { %212 = vmatpush.msra.mxu1 %v68_v22  ;;  %250 = vmatpush.msra.mxu3 %v102_v32  ;;  %v62_v46 = vld [vmem:[#allocation2 + $0x90] sm:$0xff]  ;;  %v45_v49 = vld [vmem:[#allocation2 + $0x8] sm:$0xff]  ;;  %v44_v51 = vld [vmem:[#allocation2] sm:$0xff] }
  0x16   :  { %193 = vmatpush.msra.mxu0 %v51_v25  ;;  %231 = vmatpush.msra.mxu2 %v85_v31  ;;  %v98_v48 = vld [vmem:[#allocation2 + $0x1b0] sm:$0xff]  ;;  %v61_v50 = vld [vmem:[#allocation2 + $0x88] sm:$0xff]  ;;  %v80_v52 = vld [vmem:[#allocation2 + $0x120] sm:$0xff] }
  0x17   :  { %213 = vmatpush.msra.mxu1 %v67_v26  ;;  %251 = vmatpush.msra.mxu3 %v101_v36  ;;  %v97_v53 = vld [vmem:[#allocation2 + $0x1a8] sm:$0xff]  ;;  %v60_v54 = vld [vmem:[#allocation2 + $0x80] sm:$0xff]  ;;  %v123_v57 = vld [vmem:[#allocation2 + $0x278] sm:$0xff] }
  0x18   :  { %194 = vmatpush.msra.mxu0 %v50_v29  ;;  %232 = vmatpush.msra.mxu2 %v84_v35  ;;  %v37_v55 = vld [vmem:[%s522_s0 + $0x8] sm:$0xff]  ;;  %v139_v58 = vld [vmem:[#allocation2 + $0x2f8] sm:$0xff]  ;;  %v122_v63 = vld [vmem:[#allocation2 + $0x270] sm:$0xff] }
  0x19   :  { %214 = vmatpush.msra.mxu1 %v66_v30  ;;  %252 = vmatpush.msra.mxu3 %v100_v40  ;;  %v41_v56 = vld [vmem:[%s522_s0 + $0x24] sm:$0xff]  ;;  %158 = vst [vmem:[#allocation1 + $0x10] ss:$2 sm:$0xff] %v37_v55  ;;  %v40_v62 = vld [vmem:[%s522_s0 + $0x1c] sm:$0xff]  ;;  %v121_v1 = vld [vmem:[#allocation2 + $0x268] sm:$0xff] }
  0x1a   :  { %195 = vmatpush.msra.mxu0 %v49_v33  ;;  %233 = vmatpush.msra.mxu2 %v83_v39  ;;  %v79_v59 = vld [vmem:[#allocation2 + $0x118] sm:$0xff]  ;;  %v96_v60 = vld [vmem:[#allocation2 + $0x1a0] sm:$0xff]  ;;  %160 = vst [vmem:[#allocation1 + $0x11] ss:$2 sm:$0xff] %v41_v56  ;;  %v138_v0 = vld [vmem:[#allocation2 + $0x2f0] sm:$0xff] }
  0x1b   :  { %215 = vmatpush.msra.mxu1 %v65_v34  ;;  %253 = vmatpush.msra.mxu3 %v99_v44  ;;  %v36_v61 = vld [vmem:[%s522_s0] sm:$0xff]  ;;  %v78_v2 = vld [vmem:[#allocation2 + $0x110] sm:$0xff]  ;;  %156 = vst [vmem:[#allocation1 + $0x1] ss:$2 sm:$0xff] %v40_v62  ;;  %v137_v4 = vld [vmem:[#allocation2 + $0x2e8] sm:$0xff] }
  0x1c   :  { %196 = vmatpush.msra.mxu0 %v48_v37  ;;  %234 = vmatpush.msra.mxu2 %v82_v43  ;;  %154 = vst [vmem:[#allocation1] ss:$2 sm:$0xff] %v36_v61  ;;  %v95_v3 = vld [vmem:[#allocation2 + $0x198] sm:$0xff]  ;;  %v39_v5 = vld [vmem:[%s522_s0 + $0x18] sm:$0xf]  ;;  %v77_v7 = vld [vmem:[#allocation2 + $0x108] sm:$0xff] }
  0x1d   :  { %216 = vmatpush.msra.mxu1 %v64_v38  ;;  %254 = vmatpush.msra.mxu3 %v98_v48  ;;  %v43_v6 = vld [vmem:[%s522_s0 + $0x34] sm:$0xf]  ;;  %v94_v8 = vld [vmem:[#allocation2 + $0x190] sm:$0xff]  ;;  %166 = vst [vmem:[#allocation1 + $0x30] ss:$2 sm:$0xff] %v39_v5  ;;  %v120_v10 = vld [vmem:[#allocation2 + $0x260] sm:$0xff] }
  0x1e   :  { %197 = vmatpush.msra.mxu0 %v47_v41  ;;  %235 = vmatpush.msra.mxu2 %v81_v47  ;;  %v38_v9 = vld [vmem:[%s522_s0 + $0x10] sm:$0xff]  ;;  %v136_v11 = vld [vmem:[#allocation2 + $0x2e0] sm:$0xff]  ;;  %168 = vst [vmem:[#allocation1 + $0x31] ss:$2 sm:$0xff] %v43_v6  ;;  %v119_v15 = vld [vmem:[#allocation2 + $0x258] sm:$0xff] }
  0x1f   :  { %217 = vmatpush.msra.mxu1 %v63_v42  ;;  %255 = vmatpush.msra.mxu3 %v97_v53  ;;  %v42_v12 = vld [vmem:[%s522_s0 + $0x2c] sm:$0xff]  ;;  %162 = vst [vmem:[#allocation1 + $0x20] ss:$2 sm:$0xff] %v38_v9  ;;  %v135_v16 = vld [vmem:[#allocation2 + $0x2d8] sm:$0xff]  ;;  %v118_v19 = vld [vmem:[#allocation2 + $0x250] sm:$0xff] }
  0x20   :  { %198 = vmatpush.msra.mxu0 %v46_v45  ;;  %236 = vmatpush.msra.mxu2 %v80_v52  ;;  %v76_v13 = vld [vmem:[#allocation2 + $0x100] sm:$0xff]  ;;  %v93_v14 = vld [vmem:[#allocation2 + $0x188] sm:$0xff]  ;;  %164 = vst [vmem:[#allocation1 + $0x21] ss:$2 sm:$0xff] %v42_v12  ;;  %v134_v20 = vld [vmem:[#allocation2 + $0x2d0] sm:$0xff] }
  0x21   :  { %218 = vmatpush.msra.mxu1 %v62_v46  ;;  %256 = vmatpush.msra.mxu3 %v96_v60  ;;  %v171_v17 = vld.sshfl [vmem:[#allocation1 + $0x10] sm:$0xff pattern:$0x75316420]  ;;  %v92_v18 = vld [vmem:[#allocation2 + $0x180] sm:$0xff]  ;;  %v341_v30 = vld [vmem:[%s525_s3 + $0x78] sm:$0xff] }
  0x22   :  { %199 = vmatpush.msra.mxu0 %v45_v49  ;;  %237 = vmatpush.msra.mxu2 %v79_v59  ;;  %v141_v21 = vld [vmem:[#allocation2 + $0x308] sm:$0xff]  ;;  %v172_v25 = vld.sshfl [vmem:[#allocation1 + $0x18] sm:$0xff pattern:$0x75316420]  ;;  %v116_v27 = vld [vmem:[#allocation2 + $0x240] sm:$0xff] }
  0x23   :  { %219 = vmatpush.msra.mxu1 %v61_v50  ;;  %257 = vmatpush.msra.mxu3 %v95_v3  ;;  %v169_v22 = vld.sshfl [vmem:[#allocation1] sm:$0xff pattern:$0x75316420]  ;;  %v117_v23 = vld [vmem:[#allocation2 + $0x248] sm:$0xff]  ;;  %v132_v28 = vld [vmem:[#allocation2 + $0x2c0] sm:$0xff] }
  0x24   :  { %200 = vmatpush.msra.mxu0 %v44_v51  ;;  %238 = vmatpush.msra.mxu2 %v78_v2  ;;  %v133_v24 = vld [vmem:[#allocation2 + $0x2c8] sm:$0xff]  ;;  %v170_v26 = vld.sshfl [vmem:[#allocation1 + $0x8] sm:$0xff pattern:$0x75316420]  ;;  %v115_v31 = vld [vmem:[#allocation2 + $0x238] sm:$0xff] }
  0x25   :  { %220 = vmatpush.msra.mxu1 %v60_v54  ;;  %258 = vmatpush.msra.mxu3 %v94_v8  ;;  %v140_v29 = vld [vmem:[#allocation2 + $0x300] sm:$0xff]  ;;  %v131_v32 = vld [vmem:[#allocation2 + $0x2b8] sm:$0xff]  ;;  %v175_v33 = vld.sshfl [vmem:[#allocation1 + $0x30] sm:$0xff pattern:$0x75316420] }
  0x26   :  { %265 = vmatpush.msrb.mxu0 %v123_v57  ;;  %239 = vmatpush.msra.mxu2 %v77_v7  ;;  %v340_v34 = vld [vmem:[%s525_s3 + $0x70] sm:$0xff]  ;;  %v114_v35 = vld [vmem:[#allocation2 + $0x230] sm:$0xff]  ;;  %v339_v37 = vld [vmem:[%s525_s3 + $0x68] sm:$0xff] }
  0x27   :  { %285 = vmatpush.msrb.mxu1 %v139_v58  ;;  %259 = vmatpush.msra.mxu3 %v93_v14  ;;  %v130_v36 = vld [vmem:[#allocation2 + $0x2b0] sm:$0xff]  ;;  %v113_v38 = vld [vmem:[#allocation2 + $0x228] sm:$0xff]  ;;  %v338_v40 = vld [vmem:[%s525_s3 + $0x60] sm:$0xff] }
  0x28   :  { %266 = vmatpush.msrb.mxu0 %v122_v63  ;;  %240 = vmatpush.msra.mxu2 %v76_v13  ;;  %v129_v39 = vld [vmem:[#allocation2 + $0x2a8] sm:$0xff]  ;;  %v112_v41 = vld [vmem:[#allocation2 + $0x220] sm:$0xff]  ;;  %v337_v43 = vld [vmem:[%s525_s3 + $0x58] sm:$0xff] }
  0x29   :  { %286 = vmatpush.msrb.mxu1 %v138_v0  ;;  %241 = vmatmul.f32.vlgmr.msra.gmra.mxu2 %v171_v17  ;;  %v128_v42 = vld [vmem:[#allocation2 + $0x2a0] sm:$0xff]  ;;  %v111_v44 = vld [vmem:[#allocation2 + $0x218] sm:$0xff]  ;;  %v336_v46 = vld [vmem:[%s525_s3 + $0x50] sm:$0xff] }
  0x2a   :  { %267 = vmatpush.msrb.mxu0 %v121_v1  ;;  %260 = vmatpush.msra.mxu3 %v92_v18  ;;  %v127_v45 = vld [vmem:[#allocation2 + $0x298] sm:$0xff]  ;;  %v110_v47 = vld [vmem:[#allocation2 + $0x210] sm:$0xff]  ;;  %v335_v49 = vld [vmem:[%s525_s3 + $0x48] sm:$0xff] }
  0x2b   :  { %287 = vmatpush.msrb.mxu1 %v137_v4  ;;  %319 = vmatpush.msrb.mxu2 %v141_v21  ;;  %v126_v48 = vld [vmem:[#allocation2 + $0x290] sm:$0xff]  ;;  %v109_v50 = vld [vmem:[#allocation2 + $0x208] sm:$0xff]  ;;  %v108_v52 = vld [vmem:[#allocation2 + $0x200] sm:$0xff] }
  0x2c   :  { %268 = vmatpush.msrb.mxu0 %v120_v10  ;;  %261 = vmatmul.f32.vlgmr.msra.gmra.mxu3 %v172_v25  ;;  %v125_v51 = vld [vmem:[#allocation2 + $0x288] sm:$0xff]  ;;  %v124_v53 = vld [vmem:[#allocation2 + $0x280] sm:$0xff]  ;;  %v173_v54 = vld.sshfl [vmem:[#allocation1 + $0x20] sm:$0xff pattern:$0x75316420] }
  0x2d   :  { %288 = vmatpush.msrb.mxu1 %v136_v11  ;;  %201 = vmatmul.f32.vlgmr.msra.gmra.mxu0 %v169_v22  ;;  %v174_v55 = vld.sshfl [vmem:[#allocation1 + $0x28] sm:$0xff pattern:$0x75316420]  ;;  %v334_v56 = vld [vmem:[%s525_s3 + $0x40] sm:$0xff]  ;;  %v333_v57 = vld [vmem:[%s525_s3 + $0x38] sm:$0xff] }
  0x2e   :  { %269 = vmatpush.msrb.mxu0 %v119_v15  ;;  %221 = vmatmul.f32.vlgmr.msra.gmra.mxu1 %v170_v26  ;;  %v332_v58 = vld [vmem:[%s525_s3 + $0x30] sm:$0xff]  ;;  %v331_v59 = vld [vmem:[%s525_s3 + $0x28] sm:$0xff]  ;;  %v330_v60 = vld [vmem:[%s525_s3 + $0x20] sm:$0xff] }
  0x2f   :  { %289 = vmatpush.msrb.mxu1 %v135_v16  ;;  %320 = vmatpush.msrb.mxu2 %v140_v29  ;;  %v329_v61 = vld [vmem:[%s525_s3 + $0x18] sm:$0xff]  ;;  %v328_v62 = vld [vmem:[%s525_s3 + $0x10] sm:$0xff]  ;;  %v327_v63 = vld [vmem:[%s525_s3 + $0x8] sm:$0xff] }
  0x30   :  { %270 = vmatpush.msrb.mxu0 %v118_v19  ;;  %346 = vmatpush.msrb.mxu3 %v341_v30  ;;  %v326_v0 = vld [vmem:[%s525_s3] sm:$0xff] }
  0x31   :  { %290 = vmatpush.msrb.mxu1 %v134_v20  ;;  %373 = vmatmul.msk.f32.vlgmr.msrb.gmra.mxu2 %vm182_vm0, %v175_v33  ;;  %v377_v1 = vld [vmem:[%s524_s2] ss:$0 sm:$0xff] }
  0x32   :  { %271 = vmatpush.msrb.mxu0 %v117_v23  ;;  %347 = vmatpush.msrb.mxu3 %v340_v34  ;;  %v378_v17 = vld [vmem:[%s526_s4] ss:$0 sm:$0xff] }
  0x33   :  { %291 = vmatpush.msrb.mxu1 %v133_v24 }
  0x34   :  { %272 = vmatpush.msrb.mxu0 %v116_v27  ;;  %348 = vmatpush.msrb.mxu3 %v339_v37 }
  0x35   :  { %292 = vmatpush.msrb.mxu1 %v132_v28 }
  0x36   :  { %273 = vmatpush.msrb.mxu0 %v115_v31  ;;  %349 = vmatpush.msrb.mxu3 %v338_v40 }
  0x37   :  { %293 = vmatpush.msrb.mxu1 %v131_v32 }
  0x38   :  { %274 = vmatpush.msrb.mxu0 %v114_v35  ;;  %350 = vmatpush.msrb.mxu3 %v337_v43 }
  0x39   :  { %294 = vmatpush.msrb.mxu1 %v130_v36 }
  0x3a   :  { %275 = vmatpush.msrb.mxu0 %v113_v38  ;;  %351 = vmatpush.msrb.mxu3 %v336_v46 }
  0x3b   :  { %295 = vmatpush.msrb.mxu1 %v129_v39 }
  0x3c   :  { %276 = vmatpush.msrb.mxu0 %v112_v41  ;;  %352 = vmatpush.msrb.mxu3 %v335_v49 }
  0x3d   :  { %296 = vmatpush.msrb.mxu1 %v128_v42 }
  0x3e   :  { %277 = vmatpush.msrb.mxu0 %v111_v44  ;;  %353 = vmatpush.msrb.mxu3 %v334_v56 }
  0x3f   :  { %297 = vmatpush.msrb.mxu1 %v127_v45 }
  0x40   :  { %278 = vmatpush.msrb.mxu0 %v110_v47  ;;  %354 = vmatpush.msrb.mxu3 %v333_v57 }
  0x41   :  { %298 = vmatpush.msrb.mxu1 %v126_v48 }
  0x42   :  { %279 = vmatpush.msrb.mxu0 %v109_v50  ;;  %355 = vmatpush.msrb.mxu3 %v332_v58 }
  0x43   :  { %299 = vmatpush.msrb.mxu1 %v125_v51 }
  0x44   :  { %280 = vmatpush.msrb.mxu0 %v108_v52  ;;  %356 = vmatpush.msrb.mxu3 %v331_v59 }
  0x45   :  { %300 = vmatpush.msrb.mxu1 %v124_v53  ;;  %281 = vmatmul.f32.vlgmr.msrb.gmra.mxu0 %v173_v54 }
  0x46   :  { %301 = vmatmul.f32.vlgmr.msrb.gmra.mxu1 %v174_v55  ;;  %357 = vmatpush.msrb.mxu3 %v330_v60 }
  0x48   :  { %358 = vmatpush.msrb.mxu3 %v329_v61 }
  0x4a   :  { %359 = vmatpush.msrb.mxu3 %v328_v62 }
  0x4c   :  { %360 = vmatpush.msrb.mxu3 %v327_v63 }
  0x4e   :  { %361 = vmatpush.msrb.mxu3 %v326_v0 }
  0xaa   :  { %v202_v2 = vpop.f32.mrf.mxu0 }
  0xab   :  { %v203_v3 = vadd.f32 %v377_v1, %v202_v2  ;;  %v222_v4 = vpop.f32.mrf.mxu1 }
  0xac   :  { %v242_v6 = vpop.f32.mrf.mxu2 }
  0xad   :  { %v223_v5 = vadd.f32 %v222_v4, %v203_v3 }
  0xaf   :  { %v243_v7 = vadd.f32 %v242_v6, %v223_v5  ;;  %v262_v8 = vpop.f32.mrf.mxu3 }
  0xb1   :  { %v263_v9 = vadd.f32 %v262_v8, %v243_v7 }
  0xb4   :  { %v322_v13 = vpop.f32.mrf.mxu2 }
  0xc2   :  { %v282_v10 = vpop.f32.mrf.mxu0 }
  0xc3   :  { %v302_v11 = vpop.f32.mrf.mxu1  ;;  %v283_v12 = vadd.f32 %v282_v10, %v263_v9 }
  0xc5   :  { %v303_v14 = vadd.f32 %v302_v11, %v283_v12 }
  0xc7   :  { %v323_v15 = vadd.f32 %v322_v13, %v303_v14 }
  0xc9   :  { %v325_v16 = vmax.f32 %v323_v15, 0.0 }
  0xcb   :  { %362 = vmatmul.f32.vlgmr.msrb.gmra.mxu3 %v325_v16 }
 0x14e   :  { %v363_v18 = vpop.f32.mrf.mxu3 }
 0x14f   :  { %v364_v19 = vadd.f32 %v378_v17, %v363_v18 }
 0x151   :  { %v366_v20 = vmax.f32 %v364_v19, 0.0 }
 0x153   :  { %367 = vst [vmem:[%s527_s5] sm:$0xff] %v366_v20 }
 0x154   :  { %372 = vsyncpa [#allocation3], 1 }

</bundles_post_ra>
